<compile_context>
chip_gen: v7x
topology: tpu7x:2x2x1
jax: 0.10.0
libtpu: 0.0.40
codegen_flags: <defaults>
</compile_context>

<pallas_src>
import jax
import jax.numpy as jnp
from jax import lax
from jax.experimental import pallas as pl
from jax.experimental.pallas import tpu as pltpu


# ----------------------------- Pallas kernel -------------------------------

def _mahalanobis_kernel(x_ref, mean_ref, icov_ref, o_ref):
    """One row-tile: m_i = (x_i - mu)^T Sigma^{-1} (x_i - mu)."""
    # Subtract in f32 (mean is f32, so a bf16/f32 x promotes); keep all VPU
    # elementwise work in f32 -- only the two MXU operands are bf16.
    delta = (x_ref[...] - mean_ref[...]).astype(jnp.float32)          # (tm, D)
    # delta @ icov^T == (icov @ delta^T)^T : contract rhs axis 1 directly,
    # so no wrapper-side transpose of inv_obj_cov is needed.
    y = lax.dot_general(
        delta.astype(jnp.bfloat16),                                   # bf16 MXU operand
        icov_ref[...],                                                # bf16 MXU operand
        dimension_numbers=(((1,), (1,)), ((), ())),
        preferred_element_type=jnp.float32)                           # (tm, D) f32 acc
    m = jnp.sum(delta * y, axis=-1, keepdims=True)                    # (tm, 1) f32
    o_ref[...] = m.astype(o_ref.dtype)


# ------------------------------- wrapper ------------------------------------

def _round_up(a, b):
    return -(-a // b) * b


def _choose_tm(m_rows, max_tm):
    """Row-tile size: whole problem when tiny, else >=2 aligned tiles."""
    if m_rows <= 256:
        return _round_up(m_rows, 8)
    # At least two grid programs (v7x has 2 TensorCores per chip) and
    # 128-row alignment for dense sublane/lane layout.
    return min(max_tm, _round_up(pl.cdiv(m_rows, 2), 128))


def mahalanobis_pallas(x2d, obj_mean, inv_obj_cov, *, max_tm=1024):
    """x2d: (M, D), obj_mean: (D,), inv_obj_cov: (D, D) -> (M,) float32."""
    M, D = x2d.shape
    mean_row = obj_mean.reshape(1, D).astype(jnp.float32)   # tiny, one-time
    icov_bf16 = inv_obj_cov.astype(jnp.bfloat16)            # tiny, one-time

    tm = _choose_tm(M, max_tm)
    grid = (pl.cdiv(M, tm),)    # last tile may overhang; OOB writes discarded

    out = pl.pallas_call(
        _mahalanobis_kernel,
        out_shape=jax.ShapeDtypeStruct((M, 1), jnp.float32),
        grid=grid,
        in_specs=[
            pl.BlockSpec((tm, D), lambda i: (i, 0)),   # row tile of x (native dtype)
            pl.BlockSpec((1, D), lambda i: (0, 0)),    # mean: VMEM-resident
            pl.BlockSpec((D, D), lambda i: (0, 0)),    # inv_obj_cov: VMEM-resident
        ],
        out_specs=pl.BlockSpec((tm, 1), lambda i: (i, 0)),
        compiler_params=pltpu.CompilerParams(
            dimension_semantics=("parallel",),
        ),
    )(x2d, mean_row, icov_bf16)

    return out[:, 0]


def full_prob_objectness_forward(x, obj_mean, inv_obj_cov):
    """x: (B, Q, D) -> Mahalanobis distance (B, Q)."""
    B, Q, D = x.shape
    m = mahalanobis_pallas(x.reshape(B * Q, D), obj_mean, inv_obj_cov)
    return m.reshape(B, Q)


# --------------------------------- main -------------------------------------

if __name__ == "__main__":
    # Module default hidden_dim=256; small batch/query counts.
    B, Q, D = 2, 8, 256

    key = jax.random.PRNGKey(0)
    kx, km, kc = jax.random.split(key, 3)

    x = jax.random.normal(kx, (B, Q, D), jnp.float32)
    # Distribution buffers (module inits mean=ones, icov=eye); perturb so the
    # kernel math is exercised non-trivially.
    obj_mean = jnp.ones((D,), jnp.float32) + 0.1 * jax.random.normal(km, (D,), jnp.float32)
    inv_obj_cov = (jnp.eye(D, dtype=jnp.float32)
                   + 0.02 * jax.random.normal(kc, (D, D), jnp.float32))

    out = full_prob_objectness_forward(x, obj_mean, inv_obj_cov)
    out = jax.block_until_ready(out)

    # Pure-JAX f32 reference matching the PyTorch forward (eval mode).
    flat = x.reshape(B * Q, D)
    delta = flat - obj_mean
    ref = jnp.sum(delta * (inv_obj_cov @ delta.T).T, axis=-1).reshape(B, Q)

    assert out.shape == (B, Q)
    # bf16 MXU operands with f32 accumulation: tolerance reflects bf16 operand
    # rounding over a D=256 contraction (reference values here are O(500)).
    assert jnp.allclose(out, ref, rtol=3e-2, atol=5e-1), (out, ref)
    print("KERNEL_OK")
</pallas_src>

<mosaic_0001>
module attributes {stable_mosaic.version = 11 : i64} {
  func.func @_mahalanobis_kernel(%arg0: i32, %arg1: memref<16x256xf32, #tpu.memory_space<vmem>>, %arg2: memref<1x256xf32, #tpu.memory_space<vmem>>, %arg3: memref<256x256xbf16, #tpu.memory_space<vmem>>, %arg4: memref<16x1xf32, #tpu.memory_space<vmem>>) attributes {dimension_semantics = [#tpu.dimension_semantics<parallel>], iteration_bounds = array<i64: 1>, scalar_prefetch = 0 : i64, scratch_operands = 0 : i64, tpu.core_type = #tpu.core_type<tc>, window_params = [{transform_indices = @transform_0, window_bounds = array<i64: 16, 256>}, {pipeline_mode = #tpu.pipeline_mode<synchronous>, transform_indices = @transform_1, window_bounds = array<i64: 1, 256>}, {pipeline_mode = #tpu.pipeline_mode<synchronous>, transform_indices = @transform_2, window_bounds = array<i64: 256, 256>}, {transform_indices = @transform_3, window_bounds = array<i64: 16, 1>}]} {
    %c0 = arith.constant 0 : index
    %c0_0 = arith.constant 0 : index
    %0 = vector.load %arg1[%c0, %c0_0] : memref<16x256xf32, #tpu.memory_space<vmem>>, vector<16x256xf32>
    %c0_1 = arith.constant 0 : index
    %c0_2 = arith.constant 0 : index
    %1 = vector.load %arg2[%c0_1, %c0_2] : memref<1x256xf32, #tpu.memory_space<vmem>>, vector<1x256xf32>
    %2 = vector.broadcast %1 : vector<1x256xf32> to vector<16x256xf32>
    %3 = arith.subf %0, %2 : vector<16x256xf32>
    %4 = arith.truncf %3 : vector<16x256xf32> to vector<16x256xbf16>
    %c0_3 = arith.constant 0 : index
    %c0_4 = arith.constant 0 : index
    %5 = vector.load %arg3[%c0_3, %c0_4] : memref<256x256xbf16, #tpu.memory_space<vmem>>, vector<256x256xbf16>
    %cst = arith.constant dense<0.000000e+00> : vector<16x256xf32>
    %6 = tpu.matmul %4, %5, %cst {dimension_numbers = #tpu.dot_dimension_numbers<[1], [1], [0], [0], [0, 0, 1, 0], [], []>} : vector<16x256xbf16>, vector<256x256xbf16>, vector<16x256xf32> -> vector<16x256xf32>
    %7 = arith.mulf %3, %6 : vector<16x256xf32>
    %cst_5 = arith.constant dense<0.000000e+00> : vector<16xf32>
    %8 = vector.multi_reduction <add>, %7, %cst_5 [1] : vector<16x256xf32> to vector<16xf32>
    %9 = vector.shape_cast %8 : vector<16xf32> to vector<16x1xf32>
    %c0_6 = arith.constant 0 : index
    %c0_7 = arith.constant 0 : index
    %10 = vector.load %arg4[%c0_6, %c0_7] : memref<16x1xf32, #tpu.memory_space<vmem>>, vector<16x1xf32>
    tpu.vector_store %arg4[%c0_6, %c0_7], %9 {strides = array<i32>} : memref<16x1xf32, #tpu.memory_space<vmem>>, vector<16x1xf32>,
    return
  }
  func.func @transform_0(%arg0: i32) -> (i32, i32) {
    %c0_i32 = arith.constant 0 : i32
    %c0_i32_0 = arith.constant 0 : i32
    return %arg0, %c0_i32 : i32, i32
  }
  func.func @transform_1(%arg0: i32) -> (i32, i32) {
    %c0_i32 = arith.constant 0 : i32
    %c0_i32_0 = arith.constant 0 : i32
    %c0_i32_1 = arith.constant 0 : i32
    return %c0_i32, %c0_i32_0 : i32, i32
  }
  func.func @transform_2(%arg0: i32) -> (i32, i32) {
    %c0_i32 = arith.constant 0 : i32
    %c0_i32_0 = arith.constant 0 : i32
    %c0_i32_1 = arith.constant 0 : i32
    return %c0_i32, %c0_i32_0 : i32, i32
  }
  func.func @transform_3(%arg0: i32) -> (i32, i32) {
    %c0_i32 = arith.constant 0 : i32
    %c0_i32_0 = arith.constant 0 : i32
    return %arg0, %c0_i32 : i32, i32
  }
}

</mosaic_0001>

<bundles_post_ra>
// kernel: tpu_custom_call.1
= control target key start
LH: loop header
LB: loop body
LE: loop exit
PB: predicated region body
PF: predicated region fallthrough
CT: control target
= control target key end

     0   :  { %8 = vsyncpa [#allocation3], 0  ;;  %s515_s0 = inlined_call_operand.hbm [shape: f32[16,256], index: 0, kind: input, shape index: {}]   ;;  %s516_s1 = inlined_call_operand.vmem [shape: f32[1,256], index: 1, kind: input, shape index: {}]   ;;  %s517_s2 = inlined_call_operand.hbm [shape: bf16[256,256], index: 2, kind: input, shape index: {}]   ;;  %s518_s3 = inlined_call_operand.vmem [shape: f32[16,1], index: 3, kind: output, shape index: {}]  }
   0x1   :  { %9 = vsyncpa [#allocation5], 0  ;;  %s452_s12 = smov [#allocation2]   ;;  %s404_s16 = scalar_lea.hbm %s515_s0, 512 }
   0x2   :  { %s15_s13 = sshll.u32 %s452_s12, 4  ;;  %p405_p0 = scmp.ne.s32.totalorder %s515_s0, %s404_s16  ;;  %s16_s13 = int_to_ptr.vmem [resolvable:$true] %s15_s13 }
   0x3   :  { %p408_p1 = scmp.lt.u32.totalorder %s404_s16, %s515_s0 }
   0x5   :  { %p410_p2 = pnand %p408_p1, %p405_p0 }
   0x7   :  { %413 = shalt.err (!%p410_p2)
}
   0x8   :  { %s414_s21 = scalar_lea.vmem %s16_s13, 512  ;;  %p419_p4 = scmp.lt.s32.totalorder %s16_s13, %s16_s13 }
   0x9   :  { %p415_p3 = scmp.ne.s32.totalorder %s16_s13, %s414_s21  ;;  %p420_p5 = scmp.lt.s32.totalorder %s414_s21, %s414_s21 }
   0xb   :  { %p421_p6 = por %p420_p5, %p419_p4 }
   0xd   :  { %p422_p7 = pnand %p421_p6, %p415_p3 }
   0xf   :  { %425 = shalt.err (!%p422_p7)
}
  0x10   :  { %s453_s22 = smov 256   ;;  %s454_s23 = smov 16  }
  0x11   :  { %21 = dma.hbm_to_vmem [thread:$0]  %s515_s0, 512, %s16_s13, [#allocation3], %s453_s22, %s453_s22, %s454_s23  }
  0x12   :  { %s455_s26 = smov [#allocation4]   ;;  %s426_s30 = scalar_lea.hbm %s517_s2, 4096 }
  0x13   :  { %s29_s27 = sshll.u32 %s455_s26, 4  ;;  %p427_p8 = scmp.ne.s32.totalorder %s517_s2, %s426_s30  ;;  %s30_s27 = int_to_ptr.vmem [resolvable:$true] %s29_s27 }
  0x14   :  { %p430_p9 = scmp.lt.u32.totalorder %s426_s30, %s517_s2 }
  0x16   :  { %p432_p10 = pnand %p430_p9, %p427_p8 }
  0x18   :  { %435 = shalt.err (!%p432_p10)
}
  0x19   :  { %s436_s8 = scalar_lea.vmem %s30_s27, 4096  ;;  %p441_p12 = scmp.lt.s32.totalorder %s30_s27, %s30_s27 }
  0x1a   :  { %p437_p11 = scmp.ne.s32.totalorder %s30_s27, %s436_s8  ;;  %p442_p13 = scmp.lt.s32.totalorder %s436_s8, %s436_s8 }
  0x1c   :  { %p443_p0 = por %p442_p13, %p441_p12 }
  0x1e   :  { %p444_p1 = pnand %p443_p0, %p437_p11 }
  0x20   :  { %447 = shalt.err (!%p444_p1)
}
  0x21   :  { %s456_s0 = smov 128   ;;  %s457_s9 = smov 8  }
  0x22   :  { %35 = dma.hbm_to_vmem [thread:$0]  %s517_s2, 4096, %s30_s27, [#allocation5], %s456_s0, %s456_s0, %s457_s9  }
  0x23   :  { %448 = dma.done.wait [#allocation3], 512  }
  0x24   :  { %449 = vsyncadd [#allocation3], 4294966784 }
  0x25   :  { %450 = dma.done.wait [#allocation5], 4096  }
  0x26   :  { %451 = vsyncadd [#allocation5], 4294963200  ;;  %v356_v0 = vld [vmem:[#allocation4 + $0x4] ss:$8 sps:$4 sm:$0xff]   ;;  %v358_v1 = vld [vmem:[#allocation4] ss:$8 sps:$4 sm:$0xff]   ;;  %v48_v5 = vlaneseq }
  0x27   :  { %256 = vmatprep.subr.bf16.mxu0 %v356_v0  ;;  %v359_v2 = vld [vmem:[#allocation4 + $0x14] ss:$8 sps:$4 sm:$0xff]   ;;  %v361_v3 = vld [vmem:[#allocation4 + $0x10] ss:$8 sps:$4 sm:$0xff]   ;;  %v362_v4 = vld [vmem:[#allocation4 + $0x24] ss:$8 sps:$4 sm:$0xff]  }
  0x28   :  { %257 = vmatpush1.bf16.xpose.msra.mxu0 %v358_v1  ;;  %v364_v6 = vld [vmem:[#allocation4 + $0x20] ss:$8 sps:$4 sm:$0xff]   ;;  %v49_v7 = vshrl.u32 %v48_v5, 7  ;;  %v365_v8 = vld [vmem:[#allocation4 + $0x34] ss:$8 sps:$4 sm:$0xff]   ;;  %vm309_vm0 = vcmask 7168  }
  0x29   :  { %258 = vmatprep.subr.bf16.mxu0 %v359_v2  ;;  %v43_v11 = vld [vmem:[#allocation2 + $0x8] sm:$0xff]  ;;  %v45_v12 = vld [vmem:[#allocation2 + $0x18] sm:$0xff]  ;;  %v46_v13 = vld [vmem:[%s516_s1] sm:$0x3] }
  0x2a   :  { %v50_v9 = vsub.s32 0, %v49_v7  ;;  %v54_v10 = vsub.s32 1, %v49_v7  ;;  %v367_v14 = vld [vmem:[#allocation4 + $0x30] ss:$8 sps:$4 sm:$0xff]   ;;  %v368_v17 = vld [vmem:[#allocation4 + $0x44] ss:$8 sps:$4 sm:$0xff]  }
  0x2b   :  { %v370_v21 = vld [vmem:[#allocation4 + $0x40] ss:$8 sps:$4 sm:$0xff]   ;;  %v371_v22 = vld [vmem:[#allocation4 + $0x54] ss:$8 sps:$4 sm:$0xff]   ;;  %v373_v23 = vld [vmem:[#allocation4 + $0x50] ss:$8 sps:$4 sm:$0xff]  }
  0x2c   :  { %v51_v15 = vrot.slane %v46_v13, %v50_v9  ;;  %v55_v16 = vrot.slane %v46_v13, %v54_v10  ;;  %v374_v24 = vld [vmem:[#allocation4 + $0x64] ss:$8 sps:$4 sm:$0xff]   ;;  %v376_v25 = vld [vmem:[#allocation4 + $0x60] ss:$8 sps:$4 sm:$0xff]   ;;  %v377_v26 = vld [vmem:[#allocation4 + $0x74] ss:$8 sps:$4 sm:$0xff]  }
  0x2d   :  { %v379_v27 = vld [vmem:[#allocation4 + $0x70] ss:$8 sps:$4 sm:$0xff]   ;;  %v380_v28 = vld [vmem:[#allocation4 + $0x84] ss:$8 sps:$4 sm:$0xff]   ;;  %v382_v29 = vld [vmem:[#allocation4 + $0x80] ss:$8 sps:$4 sm:$0xff]  }
  0x2e   :  { %v59_v18 = vsub.f32 %v43_v11, %v55_v16  ;;  %v505_v19 = vsub.f32 %v45_v12, %v55_v16  ;;  %v383_v30 = vld [vmem:[#allocation4 + $0x94] ss:$8 sps:$4 sm:$0xff]   ;;  %v385_v31 = vld [vmem:[#allocation4 + $0x90] ss:$8 sps:$4 sm:$0xff]   ;;  %v386_v32 = vld [vmem:[#allocation4 + $0xa4] ss:$8 sps:$4 sm:$0xff]  }
  0x2f   :  { %v388_v33 = vld [vmem:[#allocation4 + $0xa0] ss:$8 sps:$4 sm:$0xff]   ;;  %v389_v34 = vld [vmem:[#allocation4 + $0xb4] ss:$8 sps:$4 sm:$0xff]   ;;  %v391_v35 = vld [vmem:[#allocation4 + $0xb0] ss:$8 sps:$4 sm:$0xff]  }
  0x30   :  { %259 = vmatpush1.bf16.xpose.msra.mxu0 %v361_v3  ;;  %v63_v20 = vpack.c.bf16 %v505_v19, %v59_v18  ;;  %v392_v36 = vld [vmem:[#allocation4 + $0xc4] ss:$8 sps:$4 sm:$0xff]   ;;  %v394_v37 = vld [vmem:[#allocation4 + $0xc0] ss:$8 sps:$4 sm:$0xff]   ;;  %v395_v38 = vld [vmem:[#allocation4 + $0xd4] ss:$8 sps:$4 sm:$0xff]  }
  0x31   :  { %260 = vmatprep.subr.bf16.mxu0 %v362_v4  ;;  %v397_v39 = vld [vmem:[#allocation4 + $0xd0] ss:$8 sps:$4 sm:$0xff]   ;;  %v398_v40 = vld [vmem:[#allocation4 + $0xe4] ss:$8 sps:$4 sm:$0xff]   ;;  %v400_v41 = vld [vmem:[#allocation4 + $0xe0] ss:$8 sps:$4 sm:$0xff]  }
  0x32   :  { %288 = vmatprep.mubr.bf16.mxu0 %v63_v20  ;;  %v401_v42 = vld [vmem:[#allocation4 + $0xf4] ss:$8 sps:$4 sm:$0xff]   ;;  %v403_v43 = vld [vmem:[#allocation4 + $0xf0] ss:$8 sps:$4 sm:$0xff]   ;;  %v42_v44 = vld [vmem:[#allocation2] sm:$0xff] }
  0x33   :  { %v44_v45 = vld [vmem:[#allocation2 + $0x10] sm:$0xff]  ;;  %v58_v46 = vsub.f32 %v42_v44, %v51_v15 }
  0x34   :  { %v60_v47 = vsub.f32 %v44_v45, %v51_v15 }
  0x36   :  { %v62_v48 = vpack.c.bf16 %v60_v47, %v58_v46 }
  0x38   :  { %261 = vmatpush1.bf16.xpose.msra.mxu0 %v364_v6 }
  0x39   :  { %262 = vmatprep.subr.bf16.mxu0 %v365_v8 }
  0x40   :  { %263 = vmatpush1.bf16.xpose.msra.mxu0 %v367_v14 }
  0x41   :  { %264 = vmatprep.subr.bf16.mxu0 %v368_v17 }
  0x48   :  { %265 = vmatpush1.bf16.xpose.msra.mxu0 %v370_v21 }
  0x49   :  { %266 = vmatprep.subr.bf16.mxu0 %v371_v22 }
  0x50   :  { %267 = vmatpush1.bf16.xpose.msra.mxu0 %v373_v23 }
  0x51   :  { %268 = vmatprep.subr.bf16.mxu0 %v374_v24 }
  0x58   :  { %269 = vmatpush1.bf16.xpose.msra.mxu0 %v376_v25 }
  0x59   :  { %270 = vmatprep.subr.bf16.mxu0 %v377_v26 }
  0x60   :  { %271 = vmatpush1.bf16.xpose.msra.mxu0 %v379_v27 }
  0x61   :  { %272 = vmatprep.subr.bf16.mxu0 %v380_v28 }
  0x68   :  { %273 = vmatpush1.bf16.xpose.msra.mxu0 %v382_v29 }
  0x69   :  { %274 = vmatprep.subr.bf16.mxu0 %v383_v30 }
  0x70   :  { %275 = vmatpush1.bf16.xpose.msra.mxu0 %v385_v31 }
  0x71   :  { %276 = vmatprep.subr.bf16.mxu0 %v386_v32 }
  0x78   :  { %277 = vmatpush1.bf16.xpose.msra.mxu0 %v388_v33 }
  0x79   :  { %278 = vmatprep.subr.bf16.mxu0 %v389_v34 }
  0x80   :  { %279 = vmatpush1.bf16.xpose.msra.mxu0 %v391_v35 }
  0x81   :  { %280 = vmatprep.subr.bf16.mxu0 %v392_v36 }
  0x88   :  { %281 = vmatpush1.bf16.xpose.msra.mxu0 %v394_v37 }
  0x89   :  { %282 = vmatprep.subr.bf16.mxu0 %v395_v38 }
  0x90   :  { %283 = vmatpush1.bf16.xpose.msra.mxu0 %v397_v39 }
  0x91   :  { %284 = vmatprep.subr.bf16.mxu0 %v398_v40 }
  0x98   :  { %285 = vmatpush1.bf16.xpose.msra.mxu0 %v400_v41 }
  0x99   :  { %286 = vmatprep.subr.bf16.mxu0 %v401_v42 }
  0xa0   :  { %287 = vmatpush1.bf16.xpose.msra.mxu0 %v403_v43 }
  0xa7   :  { %289 = vmatmul.mubr.bf16.vlgmr.msra.gmra.mrb[0].mxu0 %v62_v48 }
 0x17a   :  { %v290_v49 = vpop.f32.mrb[0].mxu0 }
 0x17b   :  { %v299_v50 = vmul.f32 %v290_v49, %v58_v46  ;;  %v292_v51 = vpop.f32.mrb[1].mxu0 }
 0x17c   :  { %v300_v52 = vmul.f32 %v292_v51, %v59_v18  ;;  %v294_v53 = vpop.f32.mrb[2].mxu0 }
 0x17d   :  { %v301_v54 = vmul.f32 %v294_v53, %v60_v47  ;;  %v296_v55 = vpop.f32.mrb[3].mxu0 }
 0x17e   :  { %v302_v56 = vmul.f32 %v296_v55, %v505_v19  ;;  %v303_v57 = vadd.f32 %v300_v52, %v299_v50 }
 0x180   :  { %304 = vadd.xlane.f32.xlu0 %v303_v57  ;;  %v306_v58 = vadd.f32 %v302_v56, %v301_v54 }
 0x184   :  { %307 = vadd.xlane.f32.xlu0 %v306_v58 }
 0x20d   :  { %v305_v59 = vpop.xlane.xlu0 %304 }
 0x20e   :  { %310 = vst.msk [vmem:[%s518_s3] sm:$0xff] %vm309_vm0, %v305_v59 }
 0x211   :  { %v308_v60 = vpop.xlane.xlu0 %307 }
 0x212   :  { %311 = vst.msk [vmem:[%s518_s3 + $0x8] sm:$0xff] %vm309_vm0, %v308_v60 }
 0x213   :  { %316 = vsyncpa [#allocation3], 1 }
 0x214   :  { %317 = vsyncpa [#allocation5], 1 }

</bundles_post_ra>
